<compile_context>
chip_gen: v5e
topology: v5e:2x2
jax: 0.10.0
libtpu: 0.0.40
codegen_flags: <defaults>
</compile_context>

<pallas_src>
import jax
import jax.numpy as jnp
from jax.experimental import pallas as pl
from jax.experimental.pallas import tpu as pltpu

_LANE = 128
_ROWS_BLOCK_CAP = 512          # keep sublane blocks modest; lanes carry the volume
_MIN_SPLIT_BYTES = 512 * 1024  # only force a >=2-step grid for tensors worth sharding


def _normalize_kernel(x_ref, mean_ref, inv_std_ref, o_ref):
    # x_ref / o_ref: (rows_block, cols_block) lane-dense VMEM tiles.
    # mean_ref / inv_std_ref: (rows_block, 1) per-row constants, broadcast over lanes.
    o_ref[...] = ((x_ref[...] - mean_ref[...]) * inv_std_ref[...]).astype(o_ref.dtype)


def _tile_budget_bytes():
    """Per-tile byte budget; ~4x this (double-buffered in + out) must fit the
    default scoped VMEM of every generation (v5e 16 MiB, v6e/v7x 32 MiB)."""
    try:
        kind = jax.devices()[0].device_kind.lower()
    except Exception:
        kind = ""
    if "v5" in kind or kind == "":
        return 2 * 1024 * 1024   # conservative: fits v5e's 16 MiB default
    return 4 * 1024 * 1024       # v6e / v7x: ~16 MiB pipeline footprint


def _sublane_align(itemsize):
    # Native packed min tiles: f32 -> 8 sublanes, bf16 -> 16, int8/fp8 -> 32.
    return max(8, 32 // max(1, itemsize))


def _pick_blocks(rows, cols, itemsize, target_bytes):
    """Ragged (cdiv-friendly) tile selection.

    Lane block: full extent or a multiple of 128.
    Sublane block: full extent or a multiple of the dtype sublane alignment.
    Never returns a sublane-1 block or a block over the byte budget.
    """
    sub = _sublane_align(itemsize)
    target_elems = max(_LANE * sub, target_bytes // max(1, itemsize))

    # Lane (last) axis.
    if cols <= _LANE or cols * sub <= target_elems:
        cols_block = cols  # full extent: exempt from the 128-divisibility rule
    else:
        cols_block = max(_LANE, ((target_elems // sub) // _LANE) * _LANE)

    # Sublane (second-to-last) axis.
    rows_cap = min(_ROWS_BLOCK_CAP, max(sub, target_elems // cols_block))
    if rows <= rows_cap:
        rows_block = rows  # full extent: exempt from the 8-divisibility rule
    else:
        rows_block = max(sub, (rows_cap // sub) * sub)

    # Megacore: guarantee >= 2 grid steps along a parallel axis for tensors big
    # enough to be worth streaming across two TensorCores.
    steps = pl.cdiv(rows, rows_block) * pl.cdiv(cols, cols_block)
    if steps < 2 and rows * cols * itemsize >= _MIN_SPLIT_BYTES:
        if rows >= 2 * sub:
            rows_block = max(sub, ((rows_block // 2) // sub) * sub)
        elif cols >= 2 * _LANE:
            cols_block = max(_LANE, ((cols_block // 2) // _LANE) * _LANE)

    return rows_block, cols_block


def normalize(x, mean, std):
    """(x - mean[None,:,None,None]) / std[None,:,None,None] via a Pallas TPU kernel.

    x:    (N, C, H, W)
    mean: (C,)
    std:  (C,)
    """
    N, C, H, W = x.shape
    assert mean.shape == (C,) and std.shape == (C,)

    rows, cols = N * C, H * W
    itemsize = jnp.dtype(x.dtype).itemsize

    # Free reshape for contiguous NCHW: each row of x2 is one (n, c) plane.
    x2 = x.reshape(rows, cols)

    # Tiny per-row channel constants; reciprocal computed once, exactly, here.
    inv_std = 1.0 / std.astype(jnp.float32)
    mean_rows = jnp.tile(mean.astype(jnp.float32), N).reshape(rows, 1)
    inv_rows = jnp.tile(inv_std, N).reshape(rows, 1)

    rows_block, cols_block = _pick_blocks(rows, cols, itemsize, _tile_budget_bytes())
    grid = (pl.cdiv(rows, rows_block), pl.cdiv(cols, cols_block))

    out2 = pl.pallas_call(
        _normalize_kernel,
        out_shape=jax.ShapeDtypeStruct((rows, cols), x.dtype),
        grid=grid,
        in_specs=[
            pl.BlockSpec((rows_block, cols_block), lambda i, j: (i, j)),
            pl.BlockSpec((rows_block, 1), lambda i, j: (i, 0)),
            pl.BlockSpec((rows_block, 1), lambda i, j: (i, 0)),
        ],
        out_specs=pl.BlockSpec((rows_block, cols_block), lambda i, j: (i, j)),
        compiler_params=pltpu.CompilerParams(
            dimension_semantics=("parallel", "parallel"),
        ),
        cost_estimate=pl.CostEstimate(
            flops=2 * rows * cols,
            transcendentals=0,
            bytes_accessed=2 * rows * cols * itemsize,
        ),
    )(x2, mean_rows, inv_rows)

    return out2.reshape(N, C, H, W)


if __name__ == "__main__":
    key = jax.random.PRNGKey(0)

    # Module buffers (ImageNet-style constants; 3 channels as implied by the
    # .reshape(1, 3, 1, 1) in the PyTorch forward()).
    mean = jnp.array([0.485, 0.456, 0.406], dtype=jnp.float32)
    std = jnp.array([0.229, 0.224, 0.225], dtype=jnp.float32)

    # Small NCHW input: batch=2, channels=3, 16x16.
    x = jax.random.normal(key, (2, 3, 16, 16), dtype=jnp.float32)

    out = jax.block_until_ready(normalize(x, mean, std))

    # Reference check in plain JAX (same math as the PyTorch forward).
    ref = (x - mean.reshape(1, 3, 1, 1)) / std.reshape(1, 3, 1, 1)
    assert out.shape == x.shape and out.dtype == x.dtype
    # Multiply-by-reciprocal differs from true division by ~1 ulp.
    assert jnp.allclose(out, ref, atol=1e-5, rtol=1e-5)

    print("KERNEL_OK")
</pallas_src>

<mosaic_0001>
module attributes {stable_mosaic.version = 11 : i64} {
  func.func @_normalize_kernel(%arg0: i32, %arg1: i32, %arg2: memref<6x256xf32, #tpu.memory_space<vmem>>, %arg3: memref<6x1xf32, #tpu.memory_space<vmem>>, %arg4: memref<6x1xf32, #tpu.memory_space<vmem>>, %arg5: memref<6x256xf32, #tpu.memory_space<vmem>>) attributes {dimension_semantics = [#tpu.dimension_semantics<parallel>, #tpu.dimension_semantics<parallel>], iteration_bounds = array<i64: 1, 1>, scalar_prefetch = 0 : i64, scratch_operands = 0 : i64, tpu.core_type = #tpu.core_type<tc>, window_params = [{transform_indices = @transform_0, window_bounds = array<i64: 6, 256>}, {transform_indices = @transform_1, window_bounds = array<i64: 6, 1>}, {transform_indices = @transform_2, window_bounds = array<i64: 6, 1>}, {transform_indices = @transform_3, window_bounds = array<i64: 6, 256>}]} {
    %c0 = arith.constant 0 : index
    %c0_0 = arith.constant 0 : index
    %0 = vector.load %arg2[%c0, %c0_0] : memref<6x256xf32, #tpu.memory_space<vmem>>, vector<6x256xf32>
    %c0_1 = arith.constant 0 : index
    %c0_2 = arith.constant 0 : index
    %1 = vector.load %arg3[%c0_1, %c0_2] : memref<6x1xf32, #tpu.memory_space<vmem>>, vector<6x1xf32>
    %2 = vector.broadcast %1 : vector<6x1xf32> to vector<6x256xf32>
    %3 = arith.subf %0, %2 : vector<6x256xf32>
    %c0_3 = arith.constant 0 : index
    %c0_4 = arith.constant 0 : index
    %4 = vector.load %arg4[%c0_3, %c0_4] : memref<6x1xf32, #tpu.memory_space<vmem>>, vector<6x1xf32>
    %5 = vector.broadcast %4 : vector<6x1xf32> to vector<6x256xf32>
    %6 = arith.mulf %3, %5 : vector<6x256xf32>
    %c0_5 = arith.constant 0 : index
    %c0_6 = arith.constant 0 : index
    %7 = vector.load %arg5[%c0_5, %c0_6] : memref<6x256xf32, #tpu.memory_space<vmem>>, vector<6x256xf32>
    tpu.vector_store %arg5[%c0_5, %c0_6], %6 {strides = array<i32>} : memref<6x256xf32, #tpu.memory_space<vmem>>, vector<6x256xf32>,
    return
  }
  func.func @transform_0(%arg0: i32, %arg1: i32) -> (i32, i32) {
    %c0_i32 = arith.constant 0 : i32
    return %arg0, %arg1 : i32, i32
  }
  func.func @transform_1(%arg0: i32, %arg1: i32) -> (i32, i32) {
    %c0_i32 = arith.constant 0 : i32
    %c0_i32_0 = arith.constant 0 : i32
    return %arg0, %c0_i32 : i32, i32
  }
  func.func @transform_2(%arg0: i32, %arg1: i32) -> (i32, i32) {
    %c0_i32 = arith.constant 0 : i32
    %c0_i32_0 = arith.constant 0 : i32
    return %arg0, %c0_i32 : i32, i32
  }
  func.func @transform_3(%arg0: i32, %arg1: i32) -> (i32, i32) {
    %c0_i32 = arith.constant 0 : i32
    return %arg0, %arg1 : i32, i32
  }
}

</mosaic_0001>

<bundles_post_ra>
// kernel: tpu_custom_call.1
= control target key start
LH: loop header
LB: loop body
LE: loop exit
PB: predicated region body
PF: predicated region fallthrough
CT: control target
= control target key end

     0   :  { %v80_v1 = vmov 0   ;;  %s117_s0 = inlined_call_operand.vmem [shape: f32[6,256], index: 0, kind: input, shape index: {}]   ;;  %s118_s1 = inlined_call_operand.vmem [shape: f32[6,1], index: 1, kind: input, shape index: {}]   ;;  %s119_s2 = inlined_call_operand.vmem [shape: f32[6,1], index: 2, kind: input, shape index: {}]   ;;  %s120_s3 = inlined_call_operand.hbm [shape: f32[6,256], index: 3, kind: output, shape index: {}]  }
   0x1   :  { %v17_v0 = vld [vmem:[%s118_s1] sm:$0x3f]  ;;  %53 = vset.pattern.permute.xlu0 %v80_v1 }
   0x2   :  { %8 = vsyncpa [#allocation3], 0  ;;  %20 = vperm.xlu0 %53, %v17_v0   ;;  %v25_v2 = vld [vmem:[%s119_s2] sm:$0x3f]  ;;  %v16_v5 = vld [vmem:[%s117_s0 + $0x8] sm:$0x3f] }
   0x3   :  { %v15_v4 = vld [vmem:[%s117_s0] sm:$0x3f]  ;;  %s81_s1 = smov [#allocation2]   ;;  %s42_s23 = sshll.u32 %s120_s3, 4  ;;  %s43_s23 = int_to_ptr.hbm [resolvable:$true] %s42_s23 }
   0x4   :  { %s40_s20 = sshll.u32 %s81_s1, 4  ;;  %s41_s20 = int_to_ptr.vmem [resolvable:$true] %s40_s20 }
   0xa   :  { %28 = vperm.xlu0 %53, %v25_v2  }
  0x74   :  { %v21_v3 = vpop.permute.xlu0 %20 }
  0x75   :  { %v23_v6 = vsub.f32 %v15_v4, %v21_v3  ;;  %v24_v7 = vsub.f32 %v16_v5, %v21_v3 }
  0x7c   :  { %v29_v8 = vpop.permute.xlu0 %28 }
  0x7d   :  { %v31_v9 = vmul.f32 %v29_v8, %v23_v6  ;;  %v32_v10 = vmul.f32 %v29_v8, %v24_v7 }
  0x7f   :  { %33 = vst [vmem:[#allocation2] sm:$0x3f] %v31_v9 }
  0x80   :  { %34 = vst [vmem:[#allocation2 + $0x8] sm:$0x3f] %v32_v10 }
  0x81   :  { %45 = dma.vmem_to_hbm [thread:$0]  %s41_s20, 256, %s43_s23, [#allocation3]  }
  0x82   :  { %78 = dma.done.wait [#allocation3], 256  }
  0x83   :  { %79 = vsyncadd [#allocation3], 4294967040 }
  0x84   :  { %50 = vsyncpa [#allocation3], 1 }

</bundles_post_ra>
